<compile_context>
chip_gen: v7x
topology: tpu7x:2x2x1
jax: 0.10.0
libtpu: 0.0.40
codegen_flags: <defaults>
</compile_context>

<pallas_src>
from functools import partial

import jax
import jax.numpy as jnp
from jax.experimental import pallas as pl
from jax.experimental.pallas import tpu as pltpu


def conv1d_block_kernel(x_ref, w_ref, pgb_ref, gmat_ref, smat_ref, smatT_ref,
                        o_ref, xcol_ref, *, kernel_size, n_groups, eps):
    # x_ref:     (Bt, C_in, L)         f32
    # w_ref:     (C_out, K*C_in)       bf16   w2d[co, k*C_in+ci] = w[co, ci, k]
    # pgb_ref:   (C_out, 3)            f32    [:,0]=bias [:,1]=gamma [:,2]=beta
    # gmat_ref:  (C_out, C_out)        f32    1 iff same GroupNorm group
    # smat_ref:  (Bt*L, Bt)            f32    1 iff column belongs to sample bt
    # smatT_ref: (Bt, Bt*L)            f32    transpose of the above
    # o_ref:     (1, C_out, Bt*L)      f32
    # xcol_ref:  (K*C_in, Bt*L)        f32 VMEM scratch (im2col slab)
    Bt, C_in, L = x_ref.shape
    C_out = o_ref.shape[1]
    K = kernel_size
    pad = K // 2
    cpg = C_out // n_groups

    # ---- im2col into the VMEM scratch (halo handled here, no host padding) ----
    xcol_ref[...] = jnp.zeros_like(xcol_ref)        # halo columns stay zero
    for bt in range(Bt):                            # static unroll (Bt small)
        xs = x_ref[bt]                              # (C_in, L)
        for k in range(K):                          # static unroll (K small)
            s = k - pad                             # temporal shift of tap k
            if s <= 0:
                dst_lo, n, src_lo = -s, L + s, 0
            else:
                dst_lo, n, src_lo = 0, L - s, s
            xcol_ref[k * C_in:(k + 1) * C_in,
                     bt * L + dst_lo: bt * L + dst_lo + n] = xs[:, src_lo:src_lo + n]

    # ---- Conv1d: one MXU matmul, contraction = K*C_in, bf16 in / f32 acc ----
    y = jnp.dot(w_ref[...], xcol_ref[...].astype(w_ref.dtype),
                preferred_element_type=jnp.float32)          # (C_out, Bt*L)
    y = y + pgb_ref[:, 0:1]                                  # conv bias

    # ---- GroupNorm (per-sample, per-group, biased variance) ----
    S = smat_ref[...]                                        # (Bt*L, Bt)
    St = smatT_ref[...]                                      # (Bt, Bt*L)
    M = gmat_ref[...]                                        # (C_out, C_out)
    inv_n = 1.0 / float(cpg * L)

    s1 = jnp.dot(y, S, preferred_element_type=jnp.float32)             # per-chan sums  (C_out, Bt)
    mean = jnp.dot(M, s1, preferred_element_type=jnp.float32) * inv_n  # group mean     (C_out, Bt)
    yc = y - jnp.dot(mean, St, preferred_element_type=jnp.float32)     # centered       (C_out, Bt*L)
    s2 = jnp.dot(yc * yc, S, preferred_element_type=jnp.float32)       # centered sq sums
    var = jnp.dot(M, s2, preferred_element_type=jnp.float32) * inv_n   # biased group var
    scale = jax.lax.rsqrt(var + eps) * pgb_ref[:, 1:2]                 # inv_std * gamma (C_out, Bt)
    z = yc * jnp.dot(scale, St, preferred_element_type=jnp.float32) + pgb_ref[:, 2:3]

    # ---- Mish: z * tanh(softplus(z)) with a single exp ----
    t = jnp.exp(z)
    u = (1.0 + t) * (1.0 + t)
    mish = z * ((u - 1.0) * pl.reciprocal(u + 1.0, approx=True))
    mish = jnp.where(z > 20.0, z, mish)   # exp-overflow guard; tanh(softplus(z)) == 1 here
    o_ref[0] = mish.astype(o_ref.dtype)


def conv1d_block(x, w, b, gamma, beta, *, n_groups=8, eps=1e-5, batch_tile=None):
    """x: (B, C_in, L) f32; w: (C_out, C_in, K); b/gamma/beta: (C_out,)."""
    B, C_in, L = x.shape
    C_out, _, K = w.shape
    assert K % 2 == 1, "padding = K // 2 gives 'same' length only for odd K"
    assert C_out % n_groups == 0

    if batch_tile is None:                       # fold samples until ~128 lanes
        batch_tile = max(1, min(B, 128 // max(1, L)))
        while B % batch_tile:
            batch_tile -= 1
    assert B % batch_tile == 0
    Bt = batch_tile
    cpg = C_out // n_groups

    # Host-side layout plumbing (one-time, tiny).
    w2d = jnp.transpose(w, (0, 2, 1)).reshape(C_out, K * C_in).astype(jnp.bfloat16)
    pgb = jnp.stack([b, gamma, beta], axis=1).astype(jnp.float32)        # (C_out, 3)
    gidx = jnp.arange(C_out, dtype=jnp.int32) // cpg
    gmat = (gidx[:, None] == gidx[None, :]).astype(jnp.float32)          # (C_out, C_out)
    sidx = jnp.arange(Bt * L, dtype=jnp.int32) // L
    smat = (sidx[:, None] == jnp.arange(Bt, dtype=jnp.int32)[None, :]).astype(jnp.float32)
    smatT = smat.T                                                       # (Bt, Bt*L)

    kernel = partial(conv1d_block_kernel,
                     kernel_size=K, n_groups=n_groups, eps=eps)

    out_p = pl.pallas_call(
        kernel,
        out_shape=jax.ShapeDtypeStruct((B // Bt, C_out, Bt * L), x.dtype),
        grid_spec=pltpu.PrefetchScalarGridSpec(
            num_scalar_prefetch=0,
            grid=(B // Bt,),
            in_specs=[
                pl.BlockSpec((Bt, C_in, L), lambda bi: (bi, 0, 0)),
                pl.BlockSpec((C_out, K * C_in), lambda bi: (0, 0)),
                pl.BlockSpec((C_out, 3), lambda bi: (0, 0)),
                pl.BlockSpec((C_out, C_out), lambda bi: (0, 0)),
                pl.BlockSpec((Bt * L, Bt), lambda bi: (0, 0)),
                pl.BlockSpec((Bt, Bt * L), lambda bi: (0, 0)),
            ],
            out_specs=pl.BlockSpec((1, C_out, Bt * L), lambda bi: (bi, 0, 0)),
            scratch_shapes=[pltpu.VMEM((K * C_in, Bt * L), jnp.float32)],
        ),
        compiler_params=pltpu.CompilerParams(
            dimension_semantics=("parallel",)),
    )(x, w2d, pgb, gmat, smat, smatT)

    # Un-fold the lane-packed batch back to (B, C_out, L).
    out = out_p.reshape(B // Bt, C_out, Bt, L)
    out = out.transpose(0, 2, 1, 3).reshape(B, C_out, L)
    return out


def reference(x, w, b, gamma, beta, *, n_groups=8, eps=1e-5):
    """Pure-JAX f32 reference matching torch Conv1d -> GroupNorm -> Mish."""
    pad = w.shape[2] // 2
    y = jax.lax.conv_general_dilated(
        x, w, window_strides=(1,), padding=[(pad, pad)],
        dimension_numbers=("NCH", "OIH", "NCH"))
    y = y + b.reshape(1, -1, 1)
    B, C, L = y.shape
    y3 = y.reshape(B, n_groups, -1)
    mean = y3.mean(-1, keepdims=True)
    var = ((y3 - mean) ** 2).mean(-1, keepdims=True)
    yn = ((y3 - mean) / jnp.sqrt(var + eps)).reshape(B, C, L)
    z = yn * gamma.reshape(1, -1, 1) + beta.reshape(1, -1, 1)
    return z * jnp.tanh(jax.nn.softplus(z))


if __name__ == "__main__":
    # Small shapes consistent with Conv1dBlock(inp_channels=4, out_channels=16,
    # kernel_size=3, n_groups=8) applied to x of shape (B=4, C_in=4, L=16).
    B, C_in, C_out, L, K, G = 4, 4, 16, 16, 3, 8

    key = jax.random.PRNGKey(0)
    kx, kw, kb, kg, kbe = jax.random.split(key, 5)
    x = jax.random.normal(kx, (B, C_in, L), dtype=jnp.float32)
    w = jax.random.normal(kw, (C_out, C_in, K), dtype=jnp.float32) * 0.2
    b = jax.random.normal(kb, (C_out,), dtype=jnp.float32) * 0.1
    gamma = 1.0 + 0.1 * jax.random.normal(kg, (C_out,), dtype=jnp.float32)
    beta = 0.1 * jax.random.normal(kbe, (C_out,), dtype=jnp.float32)

    # batch_tile=2 -> 2 samples fused per grid step, grid=(2,) kept parallel.
    out = conv1d_block(x, w, b, gamma, beta, n_groups=G, batch_tile=2)
    out = jax.block_until_ready(out)
    assert out.shape == (B, C_out, L)

    # Tight check against a reference run on bf16-rounded inputs (matches the
    # kernel's MXU operand dtype; isolates conv/GN/Mish logic).
    xq = x.astype(jnp.bfloat16).astype(jnp.float32)
    wq = w.astype(jnp.bfloat16).astype(jnp.float32)
    ref_q = jax.block_until_ready(reference(xq, wq, b, gamma, beta, n_groups=G))
    err_q = float(jnp.max(jnp.abs(out - ref_q)))
    assert err_q < 2e-2, f"max abs error vs bf16-matched reference {err_q}"

    # Loose sanity check against the pure-f32 reference (bf16 MXU inputs).
    ref = jax.block_until_ready(reference(x, w, b, gamma, beta, n_groups=G))
    err = float(jnp.max(jnp.abs(out - ref)))
    assert err < 1e-1, f"max abs error vs f32 reference {err}"

    print("KERNEL_OK")
</pallas_src>

<mosaic_0001>
module attributes {stable_mosaic.version = 11 : i64} {
  func.func @conv1d_block_kernel(%arg0: i32, %arg1: memref<2x4x16xf32, #tpu.memory_space<vmem>>, %arg2: memref<16x12xbf16, #tpu.memory_space<vmem>>, %arg3: memref<16x3xf32, #tpu.memory_space<vmem>>, %arg4: memref<16x16xf32, #tpu.memory_space<vmem>>, %arg5: memref<32x2xf32, #tpu.memory_space<vmem>>, %arg6: memref<2x32xf32, #tpu.memory_space<vmem>>, %arg7: memref<1x16x32xf32, #tpu.memory_space<vmem>>, %arg8: memref<12x32xf32, #tpu.memory_space<vmem>>) attributes {dimension_semantics = [#tpu.dimension_semantics<parallel>], iteration_bounds = array<i64: 2>, scalar_prefetch = 0 : i64, scratch_operands = 1 : i64, tpu.core_type = #tpu.core_type<tc>, window_params = [{transform_indices = @transform_0, window_bounds = array<i64: 2, 4, 16>}, {pipeline_mode = #tpu.pipeline_mode<synchronous>, transform_indices = @transform_1, window_bounds = array<i64: 16, 12>}, {pipeline_mode = #tpu.pipeline_mode<synchronous>, transform_indices = @transform_2, window_bounds = array<i64: 16, 3>}, {pipeline_mode = #tpu.pipeline_mode<synchronous>, transform_indices = @transform_3, window_bounds = array<i64: 16, 16>}, {pipeline_mode = #tpu.pipeline_mode<synchronous>, transform_indices = @transform_4, window_bounds = array<i64: 32, 2>}, {pipeline_mode = #tpu.pipeline_mode<synchronous>, transform_indices = @transform_5, window_bounds = array<i64: 2, 32>}, {transform_indices = @transform_6, window_bounds = array<i64: 1, 16, 32>}]} {
    %cst = arith.constant 0.000000e+00 : f32
    %0 = vector.broadcast %cst : f32 to vector<12x32xf32>
    %c0 = arith.constant 0 : index
    %c0_0 = arith.constant 0 : index
    %1 = vector.load %arg8[%c0, %c0_0] : memref<12x32xf32, #tpu.memory_space<vmem>>, vector<12x32xf32>
    tpu.vector_store %arg8[%c0, %c0_0], %0 {strides = array<i32>} : memref<12x32xf32, #tpu.memory_space<vmem>>, vector<12x32xf32>,
    %c0_1 = arith.constant 0 : index
    %c0_2 = arith.constant 0 : index
    %c0_3 = arith.constant 0 : index
    %2 = vector.load %arg1[%c0_1, %c0_2, %c0_3] : memref<2x4x16xf32, #tpu.memory_space<vmem>>, vector<1x4x16xf32>
    %3 = vector.shape_cast %2 : vector<1x4x16xf32> to vector<4x16xf32>
    %4 = vector.extract_strided_slice %3 {offsets = [0, 0], sizes = [4, 15], strides = [1, 1]} : vector<4x16xf32> to vector<4x15xf32>
    %c0_4 = arith.constant 0 : index
    %c1 = arith.constant 1 : index
    %5 = vector.load %arg8[%c0_4, %c1] : memref<12x32xf32, #tpu.memory_space<vmem>>, vector<4x15xf32>
    tpu.vector_store %arg8[%c0_4, %c1], %4 {strides = array<i32>} : memref<12x32xf32, #tpu.memory_space<vmem>>, vector<4x15xf32>,
    %c4 = arith.constant 4 : index
    %c0_5 = arith.constant 0 : index
    %6 = vector.load %arg8[%c4, %c0_5] : memref<12x32xf32, #tpu.memory_space<vmem>>, vector<4x16xf32>
    tpu.vector_store %arg8[%c4, %c0_5], %3 {strides = array<i32>} : memref<12x32xf32, #tpu.memory_space<vmem>>, vector<4x16xf32>,
    %7 = vector.extract_strided_slice %3 {offsets = [0, 1], sizes = [4, 15], strides = [1, 1]} : vector<4x16xf32> to vector<4x15xf32>
    %c8 = arith.constant 8 : index
    %c0_6 = arith.constant 0 : index
    %8 = vector.load %arg8[%c8, %c0_6] : memref<12x32xf32, #tpu.memory_space<vmem>>, vector<4x15xf32>
    tpu.vector_store %arg8[%c8, %c0_6], %7 {strides = array<i32>} : memref<12x32xf32, #tpu.memory_space<vmem>>, vector<4x15xf32>,
    %c1_7 = arith.constant 1 : index
    %c0_8 = arith.constant 0 : index
    %c0_9 = arith.constant 0 : index
    %9 = vector.load %arg1[%c1_7, %c0_8, %c0_9] : memref<2x4x16xf32, #tpu.memory_space<vmem>>, vector<1x4x16xf32>
    %10 = vector.shape_cast %9 : vector<1x4x16xf32> to vector<4x16xf32>
    %11 = vector.extract_strided_slice %10 {offsets = [0, 0], sizes = [4, 15], strides = [1, 1]} : vector<4x16xf32> to vector<4x15xf32>
    %c0_10 = arith.constant 0 : index
    %c17 = arith.constant 17 : index
    %12 = vector.load %arg8[%c0_10, %c17] : memref<12x32xf32, #tpu.memory_space<vmem>>, vector<4x15xf32>
    tpu.vector_store %arg8[%c0_10, %c17], %11 {strides = array<i32>} : memref<12x32xf32, #tpu.memory_space<vmem>>, vector<4x15xf32>,
    %c4_11 = arith.constant 4 : index
    %c16 = arith.constant 16 : index
    %13 = vector.load %arg8[%c4_11, %c16] : memref<12x32xf32, #tpu.memory_space<vmem>>, vector<4x16xf32>
    tpu.vector_store %arg8[%c4_11, %c16], %10 {strides = array<i32>} : memref<12x32xf32, #tpu.memory_space<vmem>>, vector<4x16xf32>,
    %14 = vector.extract_strided_slice %10 {offsets = [0, 1], sizes = [4, 15], strides = [1, 1]} : vector<4x16xf32> to vector<4x15xf32>
    %c8_12 = arith.constant 8 : index
    %c16_13 = arith.constant 16 : index
    %15 = vector.load %arg8[%c8_12, %c16_13] : memref<12x32xf32, #tpu.memory_space<vmem>>, vector<4x15xf32>
    tpu.vector_store %arg8[%c8_12, %c16_13], %14 {strides = array<i32>} : memref<12x32xf32, #tpu.memory_space<vmem>>, vector<4x15xf32>,
    %c0_14 = arith.constant 0 : index
    %c0_15 = arith.constant 0 : index
    %16 = vector.load %arg2[%c0_14, %c0_15] : memref<16x12xbf16, #tpu.memory_space<vmem>>, vector<16x12xbf16>
    %c0_16 = arith.constant 0 : index
    %c0_17 = arith.constant 0 : index
    %17 = vector.load %arg8[%c0_16, %c0_17] : memref<12x32xf32, #tpu.memory_space<vmem>>, vector<12x32xf32>
    %18 = arith.truncf %17 : vector<12x32xf32> to vector<12x32xbf16>
    %cst_18 = arith.constant dense<0.000000e+00> : vector<16x32xf32>
    %19 = tpu.matmul %16, %18, %cst_18 {dimension_numbers = #tpu.dot_dimension_numbers<[1], [0], [0], [1], [0, 0, 1, 1], [], []>} : vector<16x12xbf16>, vector<12x32xbf16>, vector<16x32xf32> -> vector<16x32xf32>
    %c0_19 = arith.constant 0 : index
    %c0_20 = arith.constant 0 : index
    %20 = vector.load %arg3[%c0_19, %c0_20] : memref<16x3xf32, #tpu.memory_space<vmem>>, vector<16x1xf32>
    %21 = vector.broadcast %20 : vector<16x1xf32> to vector<16x32xf32>
    %22 = arith.addf %19, %21 : vector<16x32xf32>
    %c0_21 = arith.constant 0 : index
    %c0_22 = arith.constant 0 : index
    %23 = vector.load %arg5[%c0_21, %c0_22] : memref<32x2xf32, #tpu.memory_space<vmem>>, vector<32x2xf32>
    %c0_23 = arith.constant 0 : index
    %c0_24 = arith.constant 0 : index
    %24 = vector.load %arg6[%c0_23, %c0_24] : memref<2x32xf32, #tpu.memory_space<vmem>>, vector<2x32xf32>
    %c0_25 = arith.constant 0 : index
    %c0_26 = arith.constant 0 : index
    %25 = vector.load %arg4[%c0_25, %c0_26] : memref<16x16xf32, #tpu.memory_space<vmem>>, vector<16x16xf32>
    %cst_27 = arith.constant dense<0.000000e+00> : vector<16x2xf32>
    %26 = tpu.matmul %22, %23, %cst_27 {dimension_numbers = #tpu.dot_dimension_numbers<[1], [0], [0], [1], [0, 0, 1, 1], [], []>} : vector<16x32xf32>, vector<32x2xf32>, vector<16x2xf32> -> vector<16x2xf32>
    %cst_28 = arith.constant dense<0.000000e+00> : vector<16x2xf32>
    %27 = tpu.matmul %25, %26, %cst_28 {dimension_numbers = #tpu.dot_dimension_numbers<[1], [0], [0], [1], [0, 0, 1, 1], [], []>} : vector<16x16xf32>, vector<16x2xf32>, vector<16x2xf32> -> vector<16x2xf32>
    %cst_29 = arith.constant 3.125000e-02 : f32
    %28 = vector.broadcast %cst_29 : f32 to vector<16x2xf32>
    %29 = arith.mulf %27, %28 : vector<16x2xf32>
    %cst_30 = arith.constant dense<0.000000e+00> : vector<16x32xf32>
    %30 = tpu.matmul %29, %24, %cst_30 {dimension_numbers = #tpu.dot_dimension_numbers<[1], [0], [0], [1], [0, 0, 1, 1], [], []>} : vector<16x2xf32>, vector<2x32xf32>, vector<16x32xf32> -> vector<16x32xf32>
    %31 = arith.subf %22, %30 : vector<16x32xf32>
    %32 = arith.mulf %31, %31 : vector<16x32xf32>
    %cst_31 = arith.constant dense<0.000000e+00> : vector<16x2xf32>
    %33 = tpu.matmul %32, %23, %cst_31 {dimension_numbers = #tpu.dot_dimension_numbers<[1], [0], [0], [1], [0, 0, 1, 1], [], []>} : vector<16x32xf32>, vector<32x2xf32>, vector<16x2xf32> -> vector<16x2xf32>
    %cst_32 = arith.constant dense<0.000000e+00> : vector<16x2xf32>
    %34 = tpu.matmul %25, %33, %cst_32 {dimension_numbers = #tpu.dot_dimension_numbers<[1], [0], [0], [1], [0, 0, 1, 1], [], []>} : vector<16x16xf32>, vector<16x2xf32>, vector<16x2xf32> -> vector<16x2xf32>
    %cst_33 = arith.constant 3.125000e-02 : f32
    %35 = vector.broadcast %cst_33 : f32 to vector<16x2xf32>
    %36 = arith.mulf %34, %35 : vector<16x2xf32>
    %cst_34 = arith.constant 9.99999974E-6 : f32
    %37 = vector.broadcast %cst_34 : f32 to vector<16x2xf32>
    %38 = arith.addf %36, %37 : vector<16x2xf32>
    %39 = math.rsqrt %38 : vector<16x2xf32>
    %c0_35 = arith.constant 0 : index
    %c1_36 = arith.constant 1 : index
    %40 = vector.load %arg3[%c0_35, %c1_36] : memref<16x3xf32, #tpu.memory_space<vmem>>, vector<16x1xf32>
    %41 = vector.broadcast %40 : vector<16x1xf32> to vector<16x2xf32>
    %42 = arith.mulf %39, %41 : vector<16x2xf32>
    %cst_37 = arith.constant dense<0.000000e+00> : vector<16x32xf32>
    %43 = tpu.matmul %42, %24, %cst_37 {dimension_numbers = #tpu.dot_dimension_numbers<[1], [0], [0], [1], [0, 0, 1, 1], [], []>} : vector<16x2xf32>, vector<2x32xf32>, vector<16x32xf32> -> vector<16x32xf32>
    %44 = arith.mulf %31, %43 : vector<16x32xf32>
    %c0_38 = arith.constant 0 : index
    %c2 = arith.constant 2 : index
    %45 = vector.load %arg3[%c0_38, %c2] : memref<16x3xf32, #tpu.memory_space<vmem>>, vector<16x1xf32>
    %46 = vector.broadcast %45 : vector<16x1xf32> to vector<16x32xf32>
    %47 = arith.addf %44, %46 : vector<16x32xf32>
    %48 = math.exp %47 : vector<16x32xf32>
    %cst_39 = arith.constant 1.000000e+00 : f32
    %49 = vector.broadcast %cst_39 : f32 to vector<16x32xf32>
    %50 = arith.addf %49, %48 : vector<16x32xf32>
    %cst_40 = arith.constant 1.000000e+00 : f32
    %51 = vector.broadcast %cst_40 : f32 to vector<16x32xf32>
    %52 = arith.addf %51, %48 : vector<16x32xf32>
    %53 = arith.mulf %50, %52 : vector<16x32xf32>
    %cst_41 = arith.constant 1.000000e+00 : f32
    %54 = vector.broadcast %cst_41 : f32 to vector<16x32xf32>
    %55 = arith.subf %53, %54 : vector<16x32xf32>
    %cst_42 = arith.constant 1.000000e+00 : f32
    %56 = vector.broadcast %cst_42 : f32 to vector<16x32xf32>
    %57 = arith.addf %53, %56 : vector<16x32xf32>
    %58 = tpu.reciprocal %57 {approx = true} : vector<16x32xf32> -> vector<16x32xf32>
    %59 = arith.mulf %55, %58 : vector<16x32xf32>
    %60 = arith.mulf %47, %59 : vector<16x32xf32>
    %cst_43 = arith.constant 2.000000e+01 : f32
    %61 = vector.broadcast %cst_43 : f32 to vector<16x32xf32>
    %62 = arith.cmpf ogt, %47, %61 : vector<16x32xf32>
    %63 = arith.select %62, %47, %60 : vector<16x32xi1>, vector<16x32xf32>
    %c0_44 = arith.constant 0 : index
    %c0_45 = arith.constant 0 : index
    %c0_46 = arith.constant 0 : index
    %64 = vector.load %arg7[%c0_44, %c0_45, %c0_46] : memref<1x16x32xf32, #tpu.memory_space<vmem>>, vector<1x16x32xf32>
    %65 = vector.shape_cast %64 : vector<1x16x32xf32> to vector<16x32xf32>
    %66 = vector.shape_cast %63 : vector<16x32xf32> to vector<1x16x32xf32>
    tpu.vector_store %arg7[%c0_44, %c0_45, %c0_46], %66 {strides = array<i32>} : memref<1x16x32xf32, #tpu.memory_space<vmem>>, vector<1x16x32xf32>,
    return
  }
  func.func @transform_0(%arg0: i32) -> (i32, i32, i32) {
    %c0_i32 = arith.constant 0 : i32
    %c0_i32_0 = arith.constant 0 : i32
    %c0_i32_1 = arith.constant 0 : i32
    return %arg0, %c0_i32, %c0_i32_0 : i32, i32, i32
  }
  func.func @transform_1(%arg0: i32) -> (i32, i32) {
    %c0_i32 = arith.constant 0 : i32
    %c0_i32_0 = arith.constant 0 : i32
    %c0_i32_1 = arith.constant 0 : i32
    return %c0_i32, %c0_i32_0 : i32, i32
  }
  func.func @transform_2(%arg0: i32) -> (i32, i32) {
    %c0_i32 = arith.constant 0 : i32
    %c0_i32_0 = arith.constant 0 : i32
    %c0_i32_1 = arith.constant 0 : i32
    return %c0_i32, %c0_i32_0 : i32, i32
  }
  func.func @transform_3(%arg0: i32) -> (i32, i32) {
    %c0_i32 = arith.constant 0 : i32
    %c0_i32_0 = arith.constant 0 : i32
    %c0_i32_1 = arith.constant 0 : i32
    return %c0_i32, %c0_i32_0 : i32, i32
  }
  func.func @transform_4(%arg0: i32) -> (i32, i32) {
    %c0_i32 = arith.constant 0 : i32
    %c0_i32_0 = arith.constant 0 : i32
    %c0_i32_1 = arith.constant 0 : i32
    return %c0_i32, %c0_i32_0 : i32, i32
  }
  func.func @transform_5(%arg0: i32) -> (i32, i32) {
    %c0_i32 = arith.constant 0 : i32
    %c0_i32_0 = arith.constant 0 : i32
    %c0_i32_1 = arith.constant 0 : i32
    return %c0_i32, %c0_i32_0 : i32, i32
  }
  func.func @transform_6(%arg0: i32) -> (i32, i32, i32) {
    %c0_i32 = arith.constant 0 : i32
    %c0_i32_0 = arith.constant 0 : i32
    %c0_i32_1 = arith.constant 0 : i32
    return %arg0, %c0_i32, %c0_i32_0 : i32, i32, i32
  }
}

</mosaic_0001>

<bundles_post_ra>
// kernel: tpu_custom_call.1
= control target key start
LH: loop header
LB: loop body
LE: loop exit
PB: predicated region body
PF: predicated region fallthrough
CT: control target
= control target key end

     0   :  { %11 = vsyncpa [#allocation4], 0  ;;  %s1465_s0 = inlined_call_operand.vmem [shape: f32[4,4,16], index: 0, kind: input, shape index: {}]   ;;  %s1466_s1 = inlined_call_operand.vmem [shape: bf16[16,12], index: 1, kind: input, shape index: {}]   ;;  %s1467_s2 = inlined_call_operand.vmem [shape: f32[16,3], index: 2, kind: input, shape index: {}]   ;;  %s1468_s3 = inlined_call_operand.vmem [shape: f32[16,16], index: 3, kind: input, shape index: {}]   ;;  %s1469_s4 = inlined_call_operand.vmem [shape: f32[32,2], index: 4, kind: input, shape index: {}]   ;;  %s1470_s5 = inlined_call_operand.vmem [shape: f32[2,32], index: 5, kind: input, shape index: {}]   ;;  %s1471_s6 = inlined_call_operand.hbm [shape: f32[2,16,32], index: 6, kind: output, shape index: {}]  }
   0x1   :  { %13 = vsyncpa [#allocation4 + $0x1], 0  ;;  %s1304_s21 = smov 0   ;;  %s1306_s22 = smov 0  }
   0x2   :  { %s1308_s23 = smov 0   ;;  %s1310_s24 = smov 0  }
   0x3 LB: > { %s1325_s25 = sadd.s32 4294967295, %s1254_s24   ;;  %s987_s26 = sadd.s32 4294967294, %s1254_s24   ;;  %s1254_s24 = sphi %s1310_s24, %s1477_s24   ;;  %s1250_s23 = sphi %s1308_s23, %s1476_s23   ;;  %s1246_s22 = sphi %s1306_s22, %s1475_s22   ;;  %s1242_s21 = sphi %s1304_s21, %s1474_s21  }
   0x4   : > { %s1329_s27 = sadd.s32 1, %s1254_s24   ;;  %s157_s28 = sadd.s32 1, %s1250_s23 }
   0x5   : > { %s154_s29 = ssub.s32 %s1254_s24, %s1329_s27  ;;  %p167_p0 = scmp.ne.s32.totalorder %s1250_s23, %s1246_s22 }
   0x6   : > { %p155_p1 = scmp.eq.s32.totalorder %s154_s29, 0  ;;  %p168_p2 = scmp.eq.s32.totalorder %s1325_s25, 1 }
   0x7   : > { %p173_p3 = scmp.ne.s32.totalorder %s1246_s22, %s1242_s21  ;;  %p174_p4 = scmp.eq.s32.totalorder %s987_s26, 1 }
   0x8   : > { %s1340_s30 = scalar_select %p155_p1, %s1250_s23, %s157_s28  }
   0x9   : > { %p1342_p5 = por %p168_p2, %p167_p0  ;;  %p1346_p6 = por %p174_p4, %p173_p3 }
   0xa   : > { %p990_p7 = scmp.ge.s32.totalorder %s1254_s24, 1  ;;  %p216_p8 = scmp.lt.s32.totalorder %s1254_s24, 3 }
   0xc   : > { %p217_p9 = pnand %p990_p7, %p216_p8 }
   0xd   : > { %s992_s9 = sshll.u32 (!%p217_p9), %s1325_s25, 1  ;;  %vm253_vm0 = vcmask (!%p217_p9), 261120   ;;  %v1256_v0 = vmov (!%p217_p9), 0.0   ;;  %vm255_vm1 = vcmask (!%p217_p9), 257024   ;;  %vm264_vm2 = vcmask (!%p217_p9), 125952   ;;  %s1257_s14 = smov (!%p217_p9), 17  }
   0xe   : > { %220 = sbr.rel (%p217_p9) target bundleno = 1748 (0x6d4), region = 44  ;;  %p247_p10 = scmp.lt.s32.totalorder (!%p217_p9), %s992_s9, 3  ;;  %254 = vst.msk [vmem:[#allocation2] sm:$0xff] (!%p217_p9), %vm253_vm0, %v1256_v0  ;;  %1047 = vmatprep.subr.bf16.mxu0 (!%p217_p9), %v1256_v0  ;;  %vm1261_vm3 = vmmov (!%p217_p9), 0   ;;  %v1360_v3 = vld [vmem:[%s1467_s2] sm:$0xff] (!%p217_p9)  ;;  %v1365_v4 = vld [vmem:[%s1467_s2 + $0x8] sm:$0xff] (!%p217_p9) }
   0xf   : > { %256 = vst.msk [vmem:[#allocation2 + $0x8] sm:$0xf] (!%p217_p9), %vm255_vm1, %v1256_v0  ;;  %s1258_s15 = smov (!%p217_p9), 1   ;;  %s1259_s16 = smov (!%p217_p9), 16   ;;  %1049 = vmatprep.mubr.msk.bf16.mxu0 (!%p217_p9), %vm1261_vm3, %v1256_v0  ;;  %v360_v5 = vld [vmem:[%s1469_s4] sm:$0xff] (!%p217_p9)  ;;  %v1263_v6 = vmov (!%p217_p9), 0  }
  0x10   : > { %s1260_s17 = smov (!%p217_p9), 127   ;;  %s1262_s18 = smov (!%p217_p9), 15   ;;  %1174 = vset.pattern.permute.xlu1 (!%p217_p9), %v1263_v6  ;;  %1175 = vset.pattern.permute.xlu0 (!%p217_p9), %v1263_v6  ;;  %v361_v7 = vld [vmem:[%s1469_s4 + $0x8] sm:$0xff] (!%p217_p9)  ;;  %vm262_vm4 = vcmask (!%p217_p9), 125960   ;;  %vm277_vm5 = vcmask (!%p217_p9), 257160   ;;  %vm282_vm6 = vcmask (!%p217_p9), 257152  }
  0x11   : > { %v1099_v8 = vpack.c.bf16 (!%p217_p9), %v361_v7, %v360_v5  ;;  %vm269_vm7 = vcmask (!%p217_p9), 117760   ;;  %vm287_vm8 = vcmask (!%p217_p9), 248960   ;;  %vm315_vm9 = vcmask (!%p217_p9), 1045504   ;;  %v1179_v18 = vld [vmem:[%s1466_s1] sm:$0xff] (!%p217_p9)   ;;  %v362_v19 = vld [vmem:[%s1469_s4 + $0x10] sm:$0xff] (!%p217_p9)  ;;  %v363_v20 = vld [vmem:[%s1469_s4 + $0x18] sm:$0xff] (!%p217_p9) }
  0x12   : > { %vm311_vm10 = vcmask (!%p217_p9), 97280   ;;  %v1103_v21 = vpack.c.bf16 (!%p217_p9), %v363_v20, %v362_v19  ;;  %v365_v30 = vld [vmem:[%s1468_s3] sm:$0xff] (!%p217_p9)  ;;  %vm448_vm11 = vcmask (!%p217_p9), 130048   ;;  %v366_v34 = vld [vmem:[%s1468_s3 + $0x8] sm:$0xff] (!%p217_p9)  ;;  %vm539_vm12 = vcmask (!%p217_p9), 1041408   ;;  %s1018_s11 = sshll.u32 (!%p217_p9), %s1325_s25, 8 }
  0x13   : > { %1100 = vmatprep.subr.bf16.mxu1 (!%p217_p9), %v1099_v8  ;;  %v364_v35 = vld [vmem:[%s1470_s5] sm:$0x3] (!%p217_p9)  ;;  %vm532_vm13 = vcmask (!%p217_p9), 15360   ;;  %v1264_v46 = vmov (!%p217_p9), 1   ;;  %v1265_v50 = vmov (!%p217_p9), 2  }
  0x14   : > { %1102 = vmatpush3.bf16.msra.mxu1 (!%p217_p9), %v1099_v8 }
  0x15   : > { %s1479_s9 = smov (!%p247_p10, %s992_s9), 3  ;;  %1104 = vmatprep.subr.bf16.mxu1 %v1103_v21 }
  0x16   : > { %s993_s10 = sshll.u32 %s1479_s9, 2  ;;  %s243_s9 = sand.u32 1, %s1246_s22  }
  0x17   : > { %s250_s13 = scalar_lea.vmem %s1465_s0, %s993_s10  ;;  %s991_s10 = sshll.u32 %s243_s9, 4 }
  0x18   : > { %v994_v1 = vld [vmem:[%s250_s13 + $0x4] sm:$0xf]  ;;  %v257_v2 = vld [vmem:[%s250_s13] sm:$0xf]  ;;  %1106 = vmatpush3.bf16.msra.mxu1 %v1103_v21  ;;  %s245_s12 = scalar_lea.vmem [#allocation3], %s991_s10  ;;  %s1424_s25 = scalar_lea.sflag [#allocation4], %s243_s9 }
  0x19   : > { %274 = vrot.lane.b32.xlu1 %v994_v1, %s1257_s14  ;;  %259 = vrot.lane.b32.xlu0 %v257_v2, %s1258_s15  ;;  %265 = vst.msk [vmem:[#allocation2 + $0x4] sm:$0xf] %vm264_vm2, %v257_v2  ;;  %s925_s13 = sshll.u32 %s245_s12, 4  ;;  %s1420_s13 = int_to_ptr.vmem [resolvable:$true] %s925_s13 }
  0x1a   : > { %1071 = vmatprep.subr.msk.mxu1 %vm539_vm12, %v364_v35 }
  0x1d   : > { %279 = vrot.lane.b32.xlu1 %v994_v1, %s1259_s16  ;;  %266 = vrot.lane.b32.xlu0 %v257_v2, %s1260_s17  ;;  %s1418_s16 = scalar_lea.hbm %s1471_s6, %s1018_s11  ;;  %s1192_s17 = scalar_lea.vmem %s1420_s13, 256 }
  0x1e   : > { %p1193_p11 = scmp.ne.s32.totalorder %s1420_s13, %s1192_s17 }
  0x20   : > { %p1194_p12 = pnand %p1193_p11, %p1342_p5 }
  0x21   : > { %284 = vrot.lane.b32.xlu0 %v994_v1, %s1262_s18  ;;  %298 = vperm.xlu1 %1174, %v1360_v3   ;;  %s1266_s18 = smov [#allocation3]  }
  0x22   : > { %p1195_p13 = pneg %p1194_p12  ;;  %s1196_s19 = sshll.u32 %s1266_s18, 4  ;;  %s1197_s19 = int_to_ptr.vmem [resolvable:$false] %s1196_s19 }
  0x23   : > { %s1198_s20 = scalar_lea.vmem %s1197_s19, 512  ;;  %p1199_p0 = scmp.lt.s32.totalorder %s1420_s13, %s1197_s19 }
  0x24   : > { %p1200_p1 = scmp.lt.s32.totalorder %s1198_s20, %s1192_s17 }
  0x25   : > { %303 = vperm.xlu0 %1175, %v1365_v4   ;;  %1176 = vset.pattern.permute.xlu1 %v1264_v46 }
  0x26   : > { %785 = vperm.xlu1 %1176, %v1360_v3   ;;  %p1201_p2 = por %p1200_p1, %p1199_p0 }
  0x28   : > { %p1202_p3 = pnand %p1201_p2, %p1195_p13 }
  0x29   : > { %1177 = vset.pattern.permute.xlu0 %v1265_v50 }
  0x2a   : > { %789 = vperm.xlu1 %1176, %v1365_v4   ;;  %878 = vperm.xlu0 %1177, %v1360_v3  }
  0x2e   : > { %1178 = vset.pattern.permute.xlu1 %v1265_v50 }
  0x2f   : > { %882 = vperm.xlu1 %1178, %v1365_v4  }
  0x8b   : > { %v275_v9 = vpop.permute.xlu1 %274  ;;  %v260_v10 = vpop.permute.xlu0 %259 }
  0x8c   : > { %263 = vst.msk [vmem:[#allocation2] sm:$0xf] %vm262_vm4, %v260_v10 }
  0x8d   : > { %278 = vst.msk [vmem:[#allocation2] sm:$0xf] %vm277_vm5, %v275_v9 }
  0x8f   : > { %v280_v11 = vpop.permute.xlu1 %279  ;;  %v267_v12 = vpop.permute.xlu0 %266 }
  0x90   : > { %283 = vst.msk [vmem:[#allocation2 + $0x4] sm:$0xf] %vm282_vm6, %v280_v11 }
  0x91   : > { %270 = vst.msk [vmem:[#allocation2 + $0x8] sm:$0xf] %vm269_vm7, %v267_v12 }
  0x93   : > { %v285_v13 = vpop.permute.xlu0 %284 }
  0x94   : > { %288 = vst.msk [vmem:[#allocation2 + $0x8] sm:$0xf] %vm287_vm8, %v285_v13 }
  0x97   : > { %v291_v14 = vld [vmem:[#allocation2] sm:$0xff] }
  0x9b   : > { %v292_v15 = vld [vmem:[#allocation2 + $0x8] sm:$0xf] }
  0x9c   : > { %v293_v16 = vpack.c.bf16 %v292_v15, %v291_v14 }
  0x9e   : > { %v317_v17 = vsel %vm315_vm9, %v293_v16, 0 }
  0x9f   : > { %1048 = vmatpush3.bf16.msra.mxu0 %v317_v17 }
  0xa0   : > { %v299_v22 = vpop.permute.xlu1 %298 }
  0xa2   : > { %1050 = vmatmul.mubr.msk.bf16.vlgmr.msra.gmra.mrb[0].mxu0 %vm311_vm10, %v1179_v18 }
  0xa3   : > { %1068 = vmatprep.mubr.msk.f32.mxu0 %vm448_vm11, %v365_v30 }
  0xa4   : > { %v304_v24 = vpop.permute.xlu0 %303 }
  0xa5   : > { %v786_v57 = vpop.permute.xlu1 %785 }
  0xa9   : > { %v790_v61 = vpop.permute.xlu1 %789  ;;  %v879_v3 = vpop.permute.xlu0 %878 }
  0xae   : > { %v883_v0 = vpop.permute.xlu1 %882 }
 0x175   : > { %v353_v23 = vpop.f32.mrb[0].mxu0 }
 0x176   : > { %v354_v25 = vadd.f32 %v353_v23, %v299_v22  ;;  %v1051_v26 = vpop.f32.mrb[1].mxu0 }
 0x177   : > { %v356_v27 = vpop.f32.mrb[2].mxu0 }
 0x178   : > { %v357_v28 = vadd.f32 %v356_v27, %v304_v24  ;;  %v1052_v29 = vpop.f32.mrb[3].mxu0  ;;  %1061 = vmatprep.mubr.msk.f32.mxu1 %vm253_vm0, %v354_v25 }
 0x17a   : > { %1062 = vmatmul.mubr.msk.f32.vlgmr.msra.gmra.mrb[0].mxu1 %vm253_vm0, %v357_v28 }
 0x17b   : > { %1072 = vmatpush3.msk.msra.mxu1 %vm539_vm12, %v364_v35 }
 0x24d   : > { %v1063_v31 = vpop.f32.mrb[0].mxu1 }
 0x24e   : > { %v439_v32 = vpop.f32.mrb[1].mxu1 }
 0x24f   : > { %v1107_v33 = vpack.c.bf16 %v1063_v31, %v439_v32 }
 0x251   : > { %1108 = vmatprep.subr.bf16.mxu0 %v1107_v33 }
 0x252   : > { %1110 = vmatpush3.bf16.msra.mxu0 %v1107_v33 }
 0x253   : > { %1112 = vmatprep.subr.bf16.mxu0 %v1099_v8 }
 0x255   : > { %1069 = vmatmul.mubr.msk.f32.vlgmr.msra.gmra.mrb[4].mxu0 %vm448_vm11, %v366_v34 }
 0x256   : > { %1114 = vmatpush3.bf16.msra.mxu0 %v1099_v8 }
 0x257   : > { %1116 = vmatprep.subr.bf16.mxu0 %v1103_v21 }
 0x25a   : > { %1118 = vmatpush3.bf16.msra.mxu0 %v1103_v21 }
 0x328   : > { %v1070_v36 = vpop.f32.mrb[4].mxu0 }
 0x329   : > { %v521_v37 = vpop.f32.mrb[5].mxu0  ;;  %v531_v39 = vmul.f32 0.03125, %v1070_v36 }
 0x32a   : > { %v530_v38 = vmul.f32 0.03125, %v521_v37 }
 0x32c   : > { %1073 = vmatprep.mubr.msk.f32.mxu1 %vm532_vm13, %v530_v38 }
 0x32d   : > { %1074 = vmatmul.mubr.msk.f32.vlgmr.msra.gmra.mrb[2].mxu1 %vm532_vm13, %v531_v39 }
 0x32e   : > { %1091 = vmatprep.mubr.msk.f32.mxu1 %vm448_vm11, %v365_v30 }
 0x400   : > { %v1075_v40 = vpop.f32.mrb[2].mxu1 }
 0x401   : > { %v619_v41 = vsub.f32 %v357_v28, %v1075_v40  ;;  %v609_v42 = vpop.f32.mrb[3].mxu1 }
 0x402   : > { %v618_v43 = vsub.f32 %v354_v25, %v609_v42 }
 0x403   : > { %v621_v45 = vmul.f32 %v619_v41, %v619_v41 }
 0x404   : > { %v620_v44 = vmul.f32 %v618_v43, %v618_v43 }
 0x406   : > { %1084 = vmatprep.mubr.msk.f32.mxu0 %vm253_vm0, %v620_v44 }
 0x407   : > { %1085 = vmatmul.mubr.msk.f32.vlgmr.msra.gmra.mrb[6].mxu0 %vm253_vm0, %v621_v45 }
 0x4da   : > { %v1086_v47 = vpop.f32.mrb[6].mxu0 }
 0x4db   : > { %v694_v48 = vpop.f32.mrb[7].mxu0 }
 0x4dc   : > { %v1119_v49 = vpack.c.bf16 %v1086_v47, %v694_v48 }
 0x4de   : > { %1120 = vmatprep.subr.bf16.mxu1 %v1119_v49 }
 0x4df   : > { %1122 = vmatpush3.bf16.msra.mxu1 %v1119_v49 }
 0x4e0   : > { %1094 = vmatprep.subr.msk.mxu1 %vm539_vm12, %v364_v35 }
 0x4e2   : > { %1092 = vmatmul.mubr.msk.f32.vlgmr.msra.gmra.mrb[4].mxu1 %vm448_vm11, %v366_v34 }
 0x4e3   : > { %1095 = vmatpush3.msk.msra.mxu1 %vm539_vm12, %v364_v35 }
 0x5b5   : > { %v1093_v51 = vpop.f32.mrb[4].mxu1 }
 0x5b6   : > { %v779_v52 = vmul.f32 0.03125, %v1093_v51  ;;  %v769_v53 = vpop.f32.mrb[5].mxu1 }
 0x5b7   : > { %v778_v54 = vmul.f32 0.03125, %v769_v53 }
 0x5b8   : > { %v781_v55 = vadd.f32 1e-05, %v779_v52 }
 0x5b9   : > { %v780_v56 = vadd.f32 1e-05, %v778_v54 }
 0x5ba   : > { %1180 = vrsqrt.f32 %v781_v55 }
 0x5bb   : > { %1182 = vrsqrt.f32 %v780_v56 }
 0x5c4   : > { %v1181_v58 = vpop.eup %1180 }
 0x5c5   : > { %v1183_v59 = vpop.eup %1182  ;;  %v793_v62 = vmul.f32 %v1181_v58, %v790_v61 }
 0x5c6   : > { %v792_v60 = vmul.f32 %v1183_v59, %v786_v57 }
 0x5c8   : > { %1096 = vmatprep.mubr.msk.f32.mxu1 %vm532_vm13, %v792_v60 }
 0x5c9   : > { %1097 = vmatmul.mubr.msk.f32.vlgmr.msra.gmra.mrb[6].mxu1 %vm532_vm13, %v793_v62 }
 0x69c   : > { %v1098_v63 = vpop.f32.mrb[6].mxu1 }
 0x69d   : > { %v876_v1 = vmul.f32 %v1098_v63, %v619_v41  ;;  %v866_v2 = vpop.f32.mrb[7].mxu1 }
 0x69e   : > { %v875_v4 = vmul.f32 %v866_v2, %v618_v43 }
 0x69f   : > { %v886_v5 = vadd.f32 %v883_v0, %v876_v1 }
 0x6a0   : > { %v885_v6 = vadd.f32 %v879_v3, %v875_v4 }
 0x6a1   : > { %v889_v7 = vmul.f32 1.442695, %v886_v5  ;;  %vm906_vm14 = vcmp.gt.f32.partialorder %v886_v5, 20.0 }
 0x6a2   : > { %v887_v8 = vmul.f32 1.442695, %v885_v6  ;;  %vm905_vm15 = vcmp.gt.f32.partialorder %v885_v6, 20.0 }
 0x6a3   : > { %1184 = vpow2.f32 %v889_v7 }
 0x6a4   : > { %1186 = vpow2.f32 %v887_v8 }
 0x6ad   : > { %v1185_v9 = vpop.eup %1184 }
 0x6ae   : > { %v1187_v10 = vpop.eup %1186  ;;  %v892_v11 = vadd.f32 1.0, %v1185_v9 }
 0x6af   : > { %v891_v12 = vadd.f32 1.0, %v1187_v10 }
 0x6b0   : > { %v894_v13 = vmul.f32 %v892_v11, %v892_v11 }
 0x6b1   : > { %v893_v14 = vmul.f32 %v891_v12, %v891_v12 }
 0x6b2   : > { %v898_v15 = vadd.f32 1.0, %v894_v13  ;;  %v1012_v17 = vadd.f32 -1.0, %v894_v13 }
 0x6b3   : > { %v897_v16 = vadd.f32 1.0, %v893_v14  ;;  %v1011_v19 = vadd.f32 -1.0, %v893_v14 }
 0x6b4   : > { %1188 = vrcp.f32 %v898_v15 }
 0x6b5   : > { %1190 = vrcp.f32 %v897_v16 }
 0x6be   : > { %v1189_v18 = vpop.eup %1188 }
 0x6bf   : > { %v1191_v20 = vpop.eup %1190  ;;  %v902_v21 = vmul.f32 %v1189_v18, %v1012_v17 }
 0x6c0   : > { %v901_v22 = vmul.f32 %v1191_v20, %v1011_v19 }
 0x6c1   : > { %v904_v23 = vmul.f32 %v902_v21, %v886_v5 }
 0x6c2   : > { %v903_v24 = vmul.f32 %v901_v22, %v885_v6 }
 0x6c3   : > { %v908_v25 = vsel %vm906_vm14, %v886_v5, %v904_v23 }
 0x6c4   : > { %910 = vst.msk [vmem:[%s245_s12 + $0x8] sm:$0xff] %vm253_vm0, %v908_v25  ;;  %v907_v26 = vsel %vm905_vm15, %v885_v6, %v903_v24 }
 0x6c5   : > { %909 = vst.msk [vmem:[%s245_s12] sm:$0xff] %vm253_vm0, %v907_v26 }
 0x6c6   : > { %1205 = shalt.err (!%p1202_p3)
}
 0x6c7   : > { %s1206_s26 = scalar_lea.hbm %s1418_s16, 256  ;;  %s1210_s9 = scalar_lea.hbm %s1471_s6, 512 }
 0x6c8   : > { %p1207_p4 = scmp.ne.s32.totalorder %s1418_s16, %s1206_s26  ;;  %p1211_p9 = scmp.lt.u32.totalorder %s1418_s16, %s1471_s6 }
 0x6c9   : > { %p1212_p10 = scmp.lt.u32.totalorder %s1210_s9, %s1206_s26  ;;  %p1214_p12 = scmp.lt.u32.totalorder %s1206_s26, %s1418_s16 }
 0x6ca   : > { %p1208_p7 = pnand %p1207_p4, %p1342_p5 }
 0x6cb   : > { %p1213_p11 = por %p1212_p10, %p1211_p9 }
 0x6cc   : > { %p1209_p8 = pneg %p1208_p7 }
 0x6cd   : > { %p1215_p13 = por %p1214_p12, %p1213_p11 }
 0x6cf   : > { %p1216_p0 = pnand %p1215_p13, %p1209_p8 }
 0x6d1   : > { %1219 = shalt.err (!%p1216_p0)
}
 0x6d2   : > { %s1267_s12 = smov 128   ;;  %s1268_s14 = smov 8  }
 0x6d3   : > { %1123 = dma.vmem_to_hbm [thread:$0]  (%p1342_p5), %s1420_s13, 256, %s1418_s16, %s1424_s25, %s1267_s12, %s1267_s12, %s1268_s14  }
 0x6d4 PF: > { %p1129_p1 = scmp.ge.s32.totalorder %s1254_s24, 2  ;;  %s940_s15 = sand.u32 1, %s1242_s21  }
 0x6d5   : > { %s941_s17 = scalar_lea.sflag [#allocation4], %s940_s15 }
 0x6d6   : > { %p1126_p2 = pnand %p1129_p1, %p1346_p6 }
 0x6d8   : > { %1237 = dma.done.wait (!%p1126_p2), %s941_s17, 256  }
 0x6d9   : > { %1239 = vsyncadd (!%p1126_p2), %s941_s17, 4294967040  ;;  %p16_p3 = scmp.ge.s32.totalorder %s1329_s27, 4   ;;  %s1474_s21 = smov %s1246_s22 }
 0x6da   : > { %s1475_s22 = smov %s1250_s23  ;;  %s1476_s23 = smov %s1340_s30 }
 0x6db   : > { %s1477_s24 = smov %s1329_s27  ;;  %18 = sbr.rel (!%p16_p3) target bundleno = 3 (0x3), region = 80 }
 0x6e2   :  { %946 = vsyncpa [#allocation4], 1 }
 0x6e3   :  { %948 = vsyncpa [#allocation4 + $0x1], 1 }

</bundles_post_ra>
